<compile_context>
chip_gen: v7x
topology: tpu7x:2x2x1
jax: 0.10.0
libtpu: 0.0.40
codegen_flags: <defaults>
</compile_context>

<pallas_src>
import functools

import jax
import jax.numpy as jnp
from jax.experimental import pallas as pl
from jax.experimental.pallas import tpu as pltpu


_TM = 1024                       # preferred rows-per-step for GEMM-like kernels
_VMEM_LIMIT = 48 * 1024 * 1024   # scoped-VMEM request; leaves headroom on v7x's 64 MiB


def _round_up(x, m):
    return (x + m - 1) // m * m


def _row_tiling(M, preferred=_TM):
    """Pick (tm, M_pad): tm a multiple of 8 (or the full 8-padded M),
    M padded up to a multiple of tm."""
    m8 = _round_up(M, 8)
    if m8 <= preferred:
        return m8, m8
    tm = preferred
    return tm, _round_up(M, tm)


def _gemm_row_tiling(M, K, N):
    """Row tile for resident-weight GEMMs: keep double-buffered x/out tiles +
    resident bf16 weight + f32 epilogue temp under ~40 MiB."""
    budget = 40 * 1024 * 1024 - 4 * K * N       # 2 buffers x bf16 weight
    per_row = 4 * K + 12 * N                    # x(dbuf) + out(dbuf) + resid + f32 temp
    pref = max(256, min(_TM, (max(budget, 0) // per_row) // 8 * 8))
    return _row_tiling(M, preferred=pref)


def _pad_rows(x, m_pad):
    M = x.shape[0]
    if M == m_pad:
        return x
    return jnp.pad(x, ((0, m_pad - M), (0, 0)))


# ----------------------------- Pallas kernels ------------------------------

def _linear_kernel(x_ref, w_ref, b_ref, o_ref, *, act):
    """o = act(x @ w + b); full-K dot per step, weight resident in VMEM."""
    y = jnp.dot(x_ref[...], w_ref[...], preferred_element_type=jnp.float32)
    y = y + b_ref[...].astype(jnp.float32)
    if act == "gelu":
        # exact (erf-based) GELU, matching torch.nn.GELU()
        y = 0.5 * y * (1.0 + jax.lax.erf(y * jnp.float32(0.7071067811865476)))
    elif act == "tanh":
        y = jnp.tanh(y)
    o_ref[...] = y.astype(o_ref.dtype)


def linear(x, w, b, act="none"):
    """act(x @ w + b).  x: [M, K] bf16; w: [K, N] bf16 (pre-transposed, kept
    resident across the whole M loop); b: [1, N] f32."""
    M, K = x.shape
    _, N = w.shape
    tm, m_pad = _gemm_row_tiling(M, K, N)
    xp = _pad_rows(x, m_pad)
    cost = pl.CostEstimate(
        flops=2 * m_pad * N * K,
        transcendentals=m_pad * N if act in ("gelu", "tanh") else 0,
        bytes_accessed=(m_pad * K + K * N + m_pad * N) * 2 + 4 * N,
    )
    out = pl.pallas_call(
        functools.partial(_linear_kernel, act=act),
        out_shape=jax.ShapeDtypeStruct((m_pad, N), x.dtype),
        grid=(m_pad // tm,),
        in_specs=[
            pl.BlockSpec((tm, K), lambda i: (i, 0)),   # streamed activations
            pl.BlockSpec((K, N), lambda i: (0, 0)),    # weight resident in VMEM
            pl.BlockSpec((1, N), lambda i: (0, 0)),
        ],
        out_specs=pl.BlockSpec((tm, N), lambda i: (i, 0)),
        compiler_params=pltpu.CompilerParams(
            dimension_semantics=("parallel",),
            vmem_limit_bytes=_VMEM_LIMIT),
        cost_estimate=cost,
    )(xp, w, b)
    return out[:M] if m_pad != M else out


def _linear_addln_kernel(x_ref, w_ref, b_ref, r_ref, g_ref, bb_ref, o_ref):
    """o = LayerNorm(residual + x @ w + b), eps=1e-12; LN fused in the epilogue."""
    h = jnp.dot(x_ref[...], w_ref[...], preferred_element_type=jnp.float32)
    h = h + b_ref[...].astype(jnp.float32) + r_ref[...].astype(jnp.float32)
    mean = jnp.mean(h, axis=-1, keepdims=True)
    var = jnp.mean((h - mean) * (h - mean), axis=-1, keepdims=True)
    norm = (h - mean) * jax.lax.rsqrt(var + 1e-12)
    o_ref[...] = (norm * g_ref[...].astype(jnp.float32)
                  + bb_ref[...].astype(jnp.float32)).astype(o_ref.dtype)


def linear_add_layernorm(x, w, b, residual, gamma, beta):
    """LayerNorm(residual + x @ w + b). x: [M, K]; w: [K, N]; b/gamma/beta: [1, N]."""
    M, K = x.shape
    _, N = w.shape
    tm, m_pad = _gemm_row_tiling(M, K, N)
    xp = _pad_rows(x, m_pad)
    rp = _pad_rows(residual, m_pad)
    cost = pl.CostEstimate(
        flops=2 * m_pad * N * K + 10 * m_pad * N,
        transcendentals=m_pad,
        bytes_accessed=(m_pad * K + K * N + 2 * m_pad * N) * 2 + 12 * N,
    )
    out = pl.pallas_call(
        _linear_addln_kernel,
        out_shape=jax.ShapeDtypeStruct((m_pad, N), residual.dtype),
        grid=(m_pad // tm,),
        in_specs=[
            pl.BlockSpec((tm, K), lambda i: (i, 0)),   # streamed activations
            pl.BlockSpec((K, N), lambda i: (0, 0)),    # weight resident in VMEM
            pl.BlockSpec((1, N), lambda i: (0, 0)),
            pl.BlockSpec((tm, N), lambda i: (i, 0)),   # residual
            pl.BlockSpec((1, N), lambda i: (0, 0)),
            pl.BlockSpec((1, N), lambda i: (0, 0)),
        ],
        out_specs=pl.BlockSpec((tm, N), lambda i: (i, 0)),
        compiler_params=pltpu.CompilerParams(
            dimension_semantics=("parallel",),
            vmem_limit_bytes=_VMEM_LIMIT),
        cost_estimate=cost,
    )(xp, w, b, rp, gamma, beta)
    return out[:M] if m_pad != M else out


def _add3_ln_kernel(a_ref, b_ref, c_ref, g_ref, bb_ref, o_ref):
    """o = LayerNorm(a + b + c); the three embedding gathers arrive bf16 and
    are accumulated in f32 inside the kernel (no f32 HBM temp)."""
    x = (a_ref[...].astype(jnp.float32) + b_ref[...].astype(jnp.float32)
         + c_ref[...].astype(jnp.float32))
    mean = jnp.mean(x, axis=-1, keepdims=True)
    var = jnp.mean((x - mean) * (x - mean), axis=-1, keepdims=True)
    norm = (x - mean) * jax.lax.rsqrt(var + 1e-12)
    o_ref[...] = (norm * g_ref[...].astype(jnp.float32)
                  + bb_ref[...].astype(jnp.float32)).astype(o_ref.dtype)


def add3_layernorm(a, b, c, gamma, beta, out_dtype=jnp.bfloat16):
    M, H = a.shape
    tm, m_pad = _row_tiling(M, preferred=_TM)
    ap = _pad_rows(a, m_pad)
    bp = _pad_rows(b, m_pad)
    cp = _pad_rows(c, m_pad)
    out = pl.pallas_call(
        _add3_ln_kernel,
        out_shape=jax.ShapeDtypeStruct((m_pad, H), out_dtype),
        grid=(m_pad // tm,),
        in_specs=[pl.BlockSpec((tm, H), lambda i: (i, 0))] * 3
                + [pl.BlockSpec((1, H), lambda i: (0, 0))] * 2,
        out_specs=pl.BlockSpec((tm, H), lambda i: (i, 0)),
        compiler_params=pltpu.CompilerParams(
            dimension_semantics=("parallel",),
            vmem_limit_bytes=_VMEM_LIMIT),
    )(ap, bp, cp, gamma, beta)
    return out[:M] if m_pad != M else out


def _heads_per_group(nh, dh):
    """Smallest divisor g of nh with g*dh >= 128 (lane-dense blocks), else nh."""
    target = max(1, -(-128 // dh))
    for g in range(min(target, nh), nh + 1):
        if nh % g == 0:
            return g
    return nh


def _attn_kernel(q_ref, k_ref, v_ref, m_ref, o_ref, *, scale, dh, g):
    """Scaled dot-product attention for one (batch, head-group) tile.
    TODO(synk): for long sequences convert to a flash-style kernel (KV grid
                axis + online-softmax m/l/acc scratch) instead of the full
                [S, S] score matrix below."""
    mask = m_ref[0]                                 # [1, S] additive f32 mask
    q_all = q_ref[0]                                # [S, g*dh] bf16
    k_all = k_ref[0]
    v_all = v_ref[0]
    outs = []
    for h in range(g):                              # unrolled over grouped heads
        lo, hi = h * dh, (h + 1) * dh
        q = q_all[:, lo:hi]
        k = k_all[:, lo:hi]
        v = v_all[:, lo:hi]
        # fold softmax scale into q ([S,dh] multiply instead of [S,S])
        qs = (q.astype(jnp.float32) * scale).astype(q.dtype)
        s = jax.lax.dot_general(qs, k, (((1,), (1,)), ((), ())),
                                preferred_element_type=jnp.float32)   # [S, S]
        s = s + mask                                # key-padding mask
        s = s - jnp.max(s, axis=-1, keepdims=True)
        p = jnp.exp(s)
        inv = pl.reciprocal(jnp.sum(p, axis=-1, keepdims=True), approx=True)
        p = p * inv
        outs.append(jnp.dot(p.astype(v.dtype), v,
                            preferred_element_type=jnp.float32))       # [S, dh]
    o = outs[0] if g == 1 else jnp.concatenate(outs, axis=-1)
    o_ref[0] = o.astype(o_ref.dtype)


def attention(qkv, mask_add, nh, scale):
    """qkv: [B, S, 3H] bf16 (q|k|v concat, heads contiguous inside each);
       mask_add: [B, 1, S] f32 additive mask.  Returns [B, S, H], heads merged.
       Head split/merge is expressed purely through BlockSpec index_maps; heads
       are grouped per grid step so blocks are >=128 lanes wide."""
    B, S, H3 = qkv.shape
    H = H3 // 3
    dh = H // nh
    g = _heads_per_group(nh, dh)
    ng = nh // g
    cost = pl.CostEstimate(
        flops=4 * B * nh * S * S * dh,
        transcendentals=B * nh * S * S,
        bytes_accessed=(B * S * H3 + B * S * H) * 2 + 4 * B * S,
    )
    return pl.pallas_call(
        functools.partial(_attn_kernel, scale=scale, dh=dh, g=g),
        out_shape=jax.ShapeDtypeStruct((B, S, H), qkv.dtype),
        grid=(B, ng),
        in_specs=[
            pl.BlockSpec((1, S, g * dh), lambda b, j: (b, 0, j)),            # Q group j
            pl.BlockSpec((1, S, g * dh), lambda b, j: (b, 0, ng + j)),       # K group j
            pl.BlockSpec((1, S, g * dh), lambda b, j: (b, 0, 2 * ng + j)),   # V group j
            pl.BlockSpec((1, 1, S), lambda b, j: (b, 0, 0)),                 # per-batch mask
        ],
        out_specs=pl.BlockSpec((1, S, g * dh), lambda b, j: (b, 0, j)),
        compiler_params=pltpu.CompilerParams(
            dimension_semantics=("parallel", "parallel"),
            vmem_limit_bytes=_VMEM_LIMIT),
        cost_estimate=cost,
    )(qkv, qkv, qkv, mask_add)


# ----------------------------- model wrapper --------------------------------

def init_params(key, cfg):
    H = cfg["hidden_size"]
    I = cfg["intermediate_size"]
    std = cfg["initializer_range"]
    wdt = jnp.bfloat16  # storage dtype for matmul operands (bf16 MXU path)

    def normal(k, shape):
        return (jax.random.normal(k, shape, jnp.float32) * std).astype(wdt)

    keys = jax.random.split(key, 4 + cfg["num_hidden_layers"])
    params = {
        "word_emb": normal(keys[0], (cfg["vocab_size"], H)),
        "pos_emb": normal(keys[1], (cfg["max_position_embeddings"], H)),
        "type_emb": normal(keys[2], (cfg["type_vocab_size"], H)),
        "emb_ln_g": jnp.ones((1, H), jnp.float32),
        "emb_ln_b": jnp.zeros((1, H), jnp.float32),
        # all Linear weights stored pre-transposed to [in, out]; biases as [1, N]
        "pooler_w": normal(keys[3], (H, H)),
        "pooler_b": jnp.zeros((1, H), jnp.float32),
        "layers": [],
    }
    for li in range(cfg["num_hidden_layers"]):
        lk = jax.random.split(keys[4 + li], 4)
        params["layers"].append({
            "in_w": normal(lk[0], (H, 3 * H)),      # qkv in_proj, [in, out]
            "in_b": jnp.zeros((1, 3 * H), jnp.float32),
            "out_w": normal(lk[1], (H, H)),          # attention out_proj
            "out_b": jnp.zeros((1, H), jnp.float32),
            "ln1_g": jnp.ones((1, H), jnp.float32),
            "ln1_b": jnp.zeros((1, H), jnp.float32),
            "ffn1_w": normal(lk[2], (H, I)),
            "ffn1_b": jnp.zeros((1, I), jnp.float32),
            "ffn2_w": normal(lk[3], (I, H)),
            "ffn2_b": jnp.zeros((1, H), jnp.float32),
            "ln2_g": jnp.ones((1, H), jnp.float32),
            "ln2_b": jnp.zeros((1, H), jnp.float32),
        })
    return params


def encoder_layer(lp, x_bm, mask_add, nh):
    """One BertLayer in batch-major layout. x_bm: [B, S, H] bf16."""
    B, S, H = x_bm.shape
    dh = H // nh
    x2 = x_bm.reshape(B * S, H)

    # --- self attention ---
    qkv = linear(x2, lp["in_w"], lp["in_b"]).reshape(B, S, 3 * H)
    attn = attention(qkv, mask_add, nh, 1.0 / float(dh) ** 0.5)         # [B, S, H]

    # out_proj + residual + LayerNorm fused (BertSelfOutput)
    h1 = linear_add_layernorm(attn.reshape(B * S, H), lp["out_w"], lp["out_b"],
                              x2, lp["ln1_g"], lp["ln1_b"])

    # --- FFN: dense+GELU, then dense + residual + LayerNorm fused ---
    inter = linear(h1, lp["ffn1_w"], lp["ffn1_b"], act="gelu")          # BertIntermediate
    out = linear_add_layernorm(inter, lp["ffn2_w"], lp["ffn2_b"],
                               h1, lp["ln2_g"], lp["ln2_b"])            # BertOutput
    return out.reshape(B, S, H)


def bert_forward(params, cfg, input_ids, position_ids, token_type_ids, attention_mask):
    """
    input_ids:       [src_len, batch]   int32
    position_ids:    [1, src_len]       int32
    token_type_ids:  [src_len, batch]   int32
    attention_mask:  [batch, src_len]   bool (True = padded / masked)
    returns (pooled_output [batch, hidden], list of [src_len, batch, hidden])
    """
    S, B = input_ids.shape
    H = cfg["hidden_size"]
    nh = cfg["num_attention_heads"]

    # ---- embedding: gathers are XLA glue (kept bf16); sum + LayerNorm fused ----
    # TODO(synk): embedding row-gather left to XLA (dynamic gather has no clean
    #             BlockSpec form at these shapes).
    ids_bm = input_ids.T                                             # [B, S]
    we = params["word_emb"][ids_bm].reshape(B * S, H)                # bf16
    pe = jnp.broadcast_to(params["pos_emb"][position_ids[0]][None, :, :],
                          (B, S, H)).reshape(B * S, H)               # bf16
    te = params["type_emb"][token_type_ids.T].reshape(B * S, H)      # bf16
    hidden_bm = add3_layernorm(we, pe, te, params["emb_ln_g"], params["emb_ln_b"],
                               out_dtype=jnp.bfloat16).reshape(B, S, H)

    # ---- key padding mask: additive, per-batch only (no per-head broadcast) ----
    mask_add = jnp.where(attention_mask, jnp.float32(-1e30),
                         jnp.float32(0.0)).reshape(B, 1, S)

    # ---- encoder (internally batch-major [B, S, H]) ----
    layer_outs_bm = []
    out_bm = hidden_bm
    for lp in params["layers"]:
        out_bm = encoder_layer(lp, out_bm, mask_add, nh)
        layer_outs_bm.append(out_bm)

    # single layout change at the end to the reference [src_len, batch, hidden]
    stacked = jnp.transpose(jnp.stack(layer_outs_bm, axis=0), (0, 2, 1, 3))
    all_encoder_layers = [stacked[l] for l in range(len(layer_outs_bm))]

    # ---- pooler ----
    if cfg.get("pooler_type", "first_token_transform") == "first_token_transform":
        token_tensor = out_bm[:, 0, :]                   # first token of each batch
    else:  # all_token_average
        token_tensor = jnp.mean(out_bm, axis=1).astype(out_bm.dtype)
    pooled = linear(token_tensor, params["pooler_w"], params["pooler_b"], act="tanh")

    return pooled, all_encoder_layers


# --------------------------------- main --------------------------------------

if __name__ == "__main__":
    cfg = dict(
        vocab_size=50,
        hidden_size=32,
        num_attention_heads=4,
        intermediate_size=64,
        num_hidden_layers=2,
        max_position_embeddings=16,
        type_vocab_size=2,
        initializer_range=0.02,
        pooler_type="first_token_transform",
    )
    S, B = 8, 2

    root = jax.random.PRNGKey(0)
    pkey, ikey = jax.random.split(root)
    params = init_params(pkey, cfg)

    input_ids = jax.random.randint(ikey, (S, B), 0, cfg["vocab_size"], dtype=jnp.int32)
    position_ids = jnp.arange(S, dtype=jnp.int32)[None, :]           # [1, S]
    token_type_ids = jnp.zeros((S, B), jnp.int32)
    attention_mask = jnp.zeros((B, S), bool).at[1, -2:].set(True)    # pad last 2 tokens of batch 1

    pooled, enc_outs = bert_forward(params, cfg, input_ids, position_ids,
                                    token_type_ids, attention_mask)
    jax.block_until_ready(pooled)
    jax.block_until_ready(enc_outs[-1])

    assert pooled.shape == (B, cfg["hidden_size"])
    assert enc_outs[-1].shape == (S, B, cfg["hidden_size"])
    assert bool(jnp.all(jnp.isfinite(pooled.astype(jnp.float32))))
    assert bool(jnp.all(jnp.isfinite(enc_outs[-1].astype(jnp.float32))))
    print("KERNEL_OK")
</pallas_src>

<mosaic_0001>
module attributes {stable_mosaic.version = 11 : i64} {
  func.func @_add3_ln_kernel(%arg0: i32, %arg1: memref<16x32xbf16, #tpu.memory_space<vmem>>, %arg2: memref<16x32xbf16, #tpu.memory_space<vmem>>, %arg3: memref<16x32xbf16, #tpu.memory_space<vmem>>, %arg4: memref<1x32xf32, #tpu.memory_space<vmem>>, %arg5: memref<1x32xf32, #tpu.memory_space<vmem>>, %arg6: memref<16x32xbf16, #tpu.memory_space<vmem>>) attributes {dimension_semantics = [#tpu.dimension_semantics<parallel>], iteration_bounds = array<i64: 1>, scalar_prefetch = 0 : i64, scratch_operands = 0 : i64, tpu.core_type = #tpu.core_type<tc>, window_params = [{transform_indices = @transform_0, window_bounds = array<i64: 16, 32>}, {transform_indices = @transform_1, window_bounds = array<i64: 16, 32>}, {transform_indices = @transform_2, window_bounds = array<i64: 16, 32>}, {pipeline_mode = #tpu.pipeline_mode<synchronous>, transform_indices = @transform_3, window_bounds = array<i64: 1, 32>}, {pipeline_mode = #tpu.pipeline_mode<synchronous>, transform_indices = @transform_4, window_bounds = array<i64: 1, 32>}, {transform_indices = @transform_5, window_bounds = array<i64: 16, 32>}]} {
    %c0 = arith.constant 0 : index
    %c0_0 = arith.constant 0 : index
    %0 = vector.load %arg1[%c0, %c0_0] : memref<16x32xbf16, #tpu.memory_space<vmem>>, vector<16x32xbf16>
    %1 = arith.extf %0 : vector<16x32xbf16> to vector<16x32xf32>
    %c0_1 = arith.constant 0 : index
    %c0_2 = arith.constant 0 : index
    %2 = vector.load %arg2[%c0_1, %c0_2] : memref<16x32xbf16, #tpu.memory_space<vmem>>, vector<16x32xbf16>
    %3 = arith.extf %2 : vector<16x32xbf16> to vector<16x32xf32>
    %4 = arith.addf %1, %3 : vector<16x32xf32>
    %c0_3 = arith.constant 0 : index
    %c0_4 = arith.constant 0 : index
    %5 = vector.load %arg3[%c0_3, %c0_4] : memref<16x32xbf16, #tpu.memory_space<vmem>>, vector<16x32xbf16>
    %6 = arith.extf %5 : vector<16x32xbf16> to vector<16x32xf32>
    %7 = arith.addf %4, %6 : vector<16x32xf32>
    %cst = arith.constant dense<0.000000e+00> : vector<16xf32>
    %8 = vector.multi_reduction <add>, %7, %cst [1] : vector<16x32xf32> to vector<16xf32>
    %9 = vector.shape_cast %8 : vector<16xf32> to vector<16x1xf32>
    %cst_5 = arith.constant 3.200000e+01 : f32
    %10 = vector.broadcast %cst_5 : f32 to vector<16x1xf32>
    %11 = arith.divf %9, %10 : vector<16x1xf32>
    %12 = vector.broadcast %11 : vector<16x1xf32> to vector<16x32xf32>
    %13 = arith.subf %7, %12 : vector<16x32xf32>
    %14 = vector.broadcast %11 : vector<16x1xf32> to vector<16x32xf32>
    %15 = arith.subf %7, %14 : vector<16x32xf32>
    %16 = arith.mulf %13, %15 : vector<16x32xf32>
    %cst_6 = arith.constant dense<0.000000e+00> : vector<16xf32>
    %17 = vector.multi_reduction <add>, %16, %cst_6 [1] : vector<16x32xf32> to vector<16xf32>
    %18 = vector.shape_cast %17 : vector<16xf32> to vector<16x1xf32>
    %cst_7 = arith.constant 3.200000e+01 : f32
    %19 = vector.broadcast %cst_7 : f32 to vector<16x1xf32>
    %20 = arith.divf %18, %19 : vector<16x1xf32>
    %21 = vector.broadcast %11 : vector<16x1xf32> to vector<16x32xf32>
    %22 = arith.subf %7, %21 : vector<16x32xf32>
    %cst_8 = arith.constant 9.99999996E-13 : f32
    %23 = vector.broadcast %cst_8 : f32 to vector<16x1xf32>
    %24 = arith.addf %20, %23 : vector<16x1xf32>
    %25 = math.rsqrt %24 : vector<16x1xf32>
    %26 = vector.broadcast %25 : vector<16x1xf32> to vector<16x32xf32>
    %27 = arith.mulf %22, %26 : vector<16x32xf32>
    %c0_9 = arith.constant 0 : index
    %c0_10 = arith.constant 0 : index
    %28 = vector.load %arg4[%c0_9, %c0_10] : memref<1x32xf32, #tpu.memory_space<vmem>>, vector<1x32xf32>
    %29 = vector.broadcast %28 : vector<1x32xf32> to vector<16x32xf32>
    %30 = arith.mulf %27, %29 : vector<16x32xf32>
    %c0_11 = arith.constant 0 : index
    %c0_12 = arith.constant 0 : index
    %31 = vector.load %arg5[%c0_11, %c0_12] : memref<1x32xf32, #tpu.memory_space<vmem>>, vector<1x32xf32>
    %32 = vector.broadcast %31 : vector<1x32xf32> to vector<16x32xf32>
    %33 = arith.addf %30, %32 : vector<16x32xf32>
    %34 = arith.truncf %33 : vector<16x32xf32> to vector<16x32xbf16>
    %c0_13 = arith.constant 0 : index
    %c0_14 = arith.constant 0 : index
    %35 = vector.load %arg6[%c0_13, %c0_14] : memref<16x32xbf16, #tpu.memory_space<vmem>>, vector<16x32xbf16>
    tpu.vector_store %arg6[%c0_13, %c0_14], %34 {strides = array<i32>} : memref<16x32xbf16, #tpu.memory_space<vmem>>, vector<16x32xbf16>,
    return
  }
  func.func @transform_0(%arg0: i32) -> (i32, i32) {
    %c0_i32 = arith.constant 0 : i32
    %c0_i32_0 = arith.constant 0 : i32
    return %arg0, %c0_i32 : i32, i32
  }
  func.func @transform_1(%arg0: i32) -> (i32, i32) {
    %c0_i32 = arith.constant 0 : i32
    %c0_i32_0 = arith.constant 0 : i32
    return %arg0, %c0_i32 : i32, i32
  }
  func.func @transform_2(%arg0: i32) -> (i32, i32) {
    %c0_i32 = arith.constant 0 : i32
    %c0_i32_0 = arith.constant 0 : i32
    return %arg0, %c0_i32 : i32, i32
  }
  func.func @transform_3(%arg0: i32) -> (i32, i32) {
    %c0_i32 = arith.constant 0 : i32
    %c0_i32_0 = arith.constant 0 : i32
    %c0_i32_1 = arith.constant 0 : i32
    return %c0_i32, %c0_i32_0 : i32, i32
  }
  func.func @transform_4(%arg0: i32) -> (i32, i32) {
    %c0_i32 = arith.constant 0 : i32
    %c0_i32_0 = arith.constant 0 : i32
    %c0_i32_1 = arith.constant 0 : i32
    return %c0_i32, %c0_i32_0 : i32, i32
  }
  func.func @transform_5(%arg0: i32) -> (i32, i32) {
    %c0_i32 = arith.constant 0 : i32
    %c0_i32_0 = arith.constant 0 : i32
    return %arg0, %c0_i32 : i32, i32
  }
}

</mosaic_0001>

<bundles_post_ra>
// kernel: tpu_custom_call.1
= control target key start
LH: loop header
LB: loop body
LE: loop exit
PB: predicated region body
PF: predicated region fallthrough
CT: control target
= control target key end

     0   :  { %10 = vsyncpa [#allocation3], 0  ;;  %s388_s0 = inlined_call_operand.hbm [shape: bf16[16,32], index: 0, kind: input, shape index: {}]   ;;  %s389_s1 = inlined_call_operand.hbm [shape: bf16[16,32], index: 1, kind: input, shape index: {}]   ;;  %s390_s2 = inlined_call_operand.hbm [shape: bf16[16,32], index: 2, kind: input, shape index: {}]   ;;  %s391_s3 = inlined_call_operand.vmem [shape: f32[1,32], index: 3, kind: input, shape index: {}]   ;;  %s392_s4 = inlined_call_operand.vmem [shape: f32[1,32], index: 4, kind: input, shape index: {}]   ;;  %s393_s5 = inlined_call_operand.hbm [shape: bf16[16,32], index: 5, kind: output, shape index: {}]  }
   0x1   :  { %11 = vsyncpa [#allocation6], 0 }
   0x2   :  { %12 = vsyncpa [#allocation4], 0  ;;  %s275_s18 = smov [#allocation5]   ;;  %s276_s20 = smov [#allocation2]  }
   0x3   :  { %s30_s19 = sshll.u32 %s275_s18, 4  ;;  %s18_s21 = sshll.u32 %s276_s20, 4  ;;  %s31_s19 = int_to_ptr.vmem [resolvable:$true] %s30_s19  ;;  %s311_s21 = int_to_ptr.vmem [resolvable:$true] %s18_s21 }
   0x4   :  { %s181_s24 = scalar_lea.hbm %s389_s1, 128 }
   0x5   :  { %p182_p0 = scmp.ne.s32.totalorder %s389_s1, %s181_s24  ;;  %p185_p1 = scmp.lt.u32.totalorder %s181_s24, %s389_s1 }
   0x7   :  { %p187_p2 = pnand %p185_p1, %p182_p0 }
   0x9   :  { %190 = shalt.err (!%p187_p2)
}
   0xa   :  { %s191_s29 = scalar_lea.vmem %s31_s19, 128  ;;  %p196_p4 = scmp.lt.s32.totalorder %s31_s19, %s31_s19 }
   0xb   :  { %p192_p3 = scmp.ne.s32.totalorder %s31_s19, %s191_s29  ;;  %p197_p5 = scmp.lt.s32.totalorder %s191_s29, %s191_s29 }
   0xd   :  { %p198_p6 = por %p197_p5, %p196_p4 }
   0xf   :  { %p199_p7 = pnand %p198_p6, %p192_p3 }
  0x11   :  { %202 = shalt.err (!%p199_p7)
}
  0x12   :  { %s277_s30 = smov 64   ;;  %s278_s6 = smov 4  }
  0x13   :  { %36 = dma.hbm_to_vmem [thread:$0]  %s389_s1, 128, %s31_s19, [#allocation6], %s277_s30, %s277_s30, %s278_s6  }
  0x14   :  { %s203_s11 = scalar_lea.hbm %s388_s0, 128 }
  0x15   :  { %p204_p8 = scmp.ne.s32.totalorder %s388_s0, %s203_s11  ;;  %p207_p9 = scmp.lt.u32.totalorder %s203_s11, %s388_s0 }
  0x17   :  { %p209_p10 = pnand %p207_p9, %p204_p8 }
  0x19   :  { %212 = shalt.err (!%p209_p10)
}
  0x1a   :  { %s213_s16 = scalar_lea.vmem %s311_s21, 128  ;;  %p218_p12 = scmp.lt.s32.totalorder %s311_s21, %s311_s21 }
  0x1b   :  { %p214_p11 = scmp.ne.s32.totalorder %s311_s21, %s213_s16  ;;  %p219_p13 = scmp.lt.s32.totalorder %s213_s16, %s213_s16 }
  0x1d   :  { %p220_p0 = por %p219_p13, %p218_p12 }
  0x1f   :  { %p221_p1 = pnand %p220_p0, %p214_p11 }
  0x21   :  { %224 = shalt.err (!%p221_p1)
}
  0x22   :  { %24 = dma.hbm_to_vmem [thread:$0]  %s388_s0, 128, %s311_s21, [#allocation3], %s277_s30, %s277_s30, %s278_s6  }
  0x23   :  { %s279_s18 = smov [#allocation7]   ;;  %s225_s23 = scalar_lea.hbm %s390_s2, 128 }
  0x24   :  { %s42_s19 = sshll.u32 %s279_s18, 4  ;;  %p226_p2 = scmp.ne.s32.totalorder %s390_s2, %s225_s23  ;;  %s43_s19 = int_to_ptr.vmem [resolvable:$true] %s42_s19 }
  0x25   :  { %p229_p3 = scmp.lt.u32.totalorder %s225_s23, %s390_s2 }
  0x27   :  { %p231_p4 = pnand %p229_p3, %p226_p2 }
  0x29   :  { %234 = shalt.err (!%p231_p4)
}
  0x2a   :  { %s235_s28 = scalar_lea.vmem %s43_s19, 128  ;;  %p240_p6 = scmp.lt.s32.totalorder %s43_s19, %s43_s19 }
  0x2b   :  { %p236_p5 = scmp.ne.s32.totalorder %s43_s19, %s235_s28  ;;  %p241_p7 = scmp.lt.s32.totalorder %s235_s28, %s235_s28 }
  0x2d   :  { %p242_p8 = por %p241_p7, %p240_p6 }
  0x2f   :  { %p243_p9 = pnand %p242_p8, %p236_p5 }
  0x31   :  { %246 = shalt.err (!%p243_p9)
}
  0x32   :  { %48 = dma.hbm_to_vmem [thread:$0]  %s390_s2, 128, %s43_s19, [#allocation6], %s277_s30, %s277_s30, %s278_s6  }
  0x33   :  { %269 = dma.done.wait [#allocation3], 128  }
  0x34   :  { %270 = vsyncadd [#allocation3], 4294967168 }
  0x35   :  { %271 = dma.done.wait [#allocation6], 256  }
  0x36   :  { %272 = vsyncadd [#allocation6], 4294967040  ;;  %v160_v0 = vld [vmem:[#allocation2] sm:$0xff]   ;;  %v164_v1 = vld [vmem:[#allocation5] sm:$0xff]   ;;  %vm78_vm0 = vcmask 261120   ;;  %vm132_vm1 = vcmask 257024  }
  0x37   :  { %v168_v2 = vld [vmem:[#allocation7] sm:$0xff]   ;;  %v161_v3 = vunpack.c.l.bf16 %v160_v0  ;;  %v165_v4 = vunpack.c.l.bf16 %v164_v1  ;;  %v162_v6 = vunpack.c.h.bf16 %v160_v0  ;;  %v166_v7 = vunpack.c.h.bf16 %v164_v1  ;;  %v153_v32 = vld [vmem:[%s391_s3] ss:$0 sm:$0xff]  ;;  %s280_s9 = smov [#allocation8]  }
  0x38   :  { %v169_v5 = vunpack.c.l.bf16 %v168_v2  ;;  %v170_v8 = vunpack.c.h.bf16 %v168_v2  ;;  %v154_v34 = vld [vmem:[%s392_s4] ss:$0 sm:$0xff]  ;;  %s140_s10 = sshll.u32 %s280_s9, 4  ;;  %s141_s10 = int_to_ptr.vmem [resolvable:$true] %s140_s10 }
  0x39   :  { %v70_v9 = vadd.f32 %v165_v4, %v161_v3  ;;  %v71_v10 = vadd.f32 %v166_v7, %v162_v6  ;;  %s247_s3 = scalar_lea.vmem %s141_s10, 128  ;;  %p252_p11 = scmp.lt.s32.totalorder %s141_s10, %s141_s10 }
  0x3a   :  { %p248_p10 = scmp.ne.s32.totalorder %s141_s10, %s247_s3  ;;  %p253_p12 = scmp.lt.s32.totalorder %s247_s3, %s247_s3 }
  0x3b   :  { %v76_v11 = vadd.f32 %v169_v5, %v70_v9  ;;  %v77_v12 = vadd.f32 %v170_v8, %v71_v10 }
  0x3c   :  { %p254_p13 = por %p253_p12, %p252_p11 }
  0x3d   :  { %v79_v13 = vsel %vm78_vm0, %v76_v11, 0.0  ;;  %v82_v14 = vsel %vm78_vm0, %v77_v12, 0.0 }
  0x3e   :  { %80 = vadd.xlane.f32.xlu0 %v79_v13  ;;  %p255_p0 = pnand %p254_p13, %p248_p10 }
  0x42   :  { %83 = vadd.xlane.f32.xlu0 %v82_v14 }
  0xcb   :  { %v81_v15 = vpop.xlane.xlu0 %80 }
  0xcc   :  { %v86_v16 = vmul.f32 0.03125, %v81_v15 }
  0xce   :  { %v88_v17 = vsub.f32 %v76_v11, %v86_v16 }
  0xcf   :  { %v84_v18 = vpop.xlane.xlu0 %83 }
  0xd0   :  { %v87_v19 = vmul.f32 0.03125, %v84_v18  ;;  %v90_v20 = vmul.f32 %v88_v17, %v88_v17 }
  0xd2   :  { %v89_v21 = vsub.f32 %v77_v12, %v87_v19  ;;  %v92_v22 = vsel %vm78_vm0, %v90_v20, 0.0 }
  0xd3   :  { %93 = vadd.xlane.f32.xlu1 %v92_v22 }
  0xd4   :  { %v91_v23 = vmul.f32 %v89_v21, %v89_v21 }
  0xd6   :  { %v95_v24 = vsel %vm78_vm0, %v91_v23, 0.0 }
  0xd7   :  { %96 = vadd.xlane.f32.xlu1 %v95_v24 }
 0x160   :  { %v94_v25 = vpop.xlane.xlu1 %93 }
 0x161   :  { %v98_v26 = vmul.f32 0.03125, %v94_v25 }
 0x163   :  { %v100_v27 = vadd.f32 1e-12, %v98_v26 }
 0x164   :  { %v97_v28 = vpop.xlane.xlu1 %96 }
 0x165   :  { %177 = vrsqrt.f32 %v100_v27  ;;  %v99_v29 = vmul.f32 0.03125, %v97_v28 }
 0x167   :  { %v101_v30 = vadd.f32 1e-12, %v99_v29 }
 0x169   :  { %179 = vrsqrt.f32 %v101_v30 }
 0x16f   :  { %v178_v31 = vpop.eup %177 }
 0x170   :  { %v104_v33 = vmul.f32 %v178_v31, %v88_v17 }
 0x172   :  { %v113_v35 = vmul.f32 %v153_v32, %v104_v33 }
 0x173   :  { %v180_v36 = vpop.eup %179 }
 0x174   :  { %v105_v37 = vmul.f32 %v180_v36, %v89_v21  ;;  %v122_v38 = vadd.f32 %v154_v34, %v113_v35 }
 0x176   :  { %v114_v39 = vmul.f32 %v153_v32, %v105_v37  ;;  %v157_v40 = vpack.c.bf16 %v122_v38, %v122_v38 }
 0x178   :  { %v123_v41 = vadd.f32 %v154_v34, %v114_v39  ;;  %133 = vst.msk [vmem:[#allocation8] sm:$0xf] %vm132_vm1, %v157_v40 }
 0x17a   :  { %v158_v42 = vpack.c.bf16 %v123_v41, %v123_v41 }
 0x17c   :  { %134 = vst.msk [vmem:[#allocation8 + $0x4] sm:$0xf] %vm132_vm1, %v158_v42 }
 0x17d   :  { %258 = shalt.err (!%p255_p0)
}
 0x17e   :  { %s259_s12 = scalar_lea.hbm %s393_s5, 128 }
 0x17f   :  { %p260_p1 = scmp.ne.s32.totalorder %s393_s5, %s259_s12  ;;  %p263_p2 = scmp.lt.u32.totalorder %s259_s12, %s393_s5 }
 0x181   :  { %p265_p3 = pnand %p263_p2, %p260_p1 }
 0x183   :  { %268 = shalt.err (!%p265_p3)
}
 0x184   :  { %146 = dma.vmem_to_hbm [thread:$0]  %s141_s10, 128, %s393_s5, [#allocation4], %s277_s30, %s277_s30, %s278_s6  }
 0x185   :  { %273 = dma.done.wait [#allocation4], 128  }
 0x186   :  { %274 = vsyncadd [#allocation4], 4294967168 }
 0x187   :  { %150 = vsyncpa [#allocation3], 1 }
 0x188   :  { %151 = vsyncpa [#allocation6], 1 }
 0x189   :  { %152 = vsyncpa [#allocation4], 1 }

</bundles_post_ra>
